<compile_context>
chip_gen: v5e
topology: v5e:2x2
jax: 0.10.0
libtpu: 0.0.40
codegen_flags: <defaults>
</compile_context>

<pallas_src>
import jax
import jax.numpy as jnp
from jax.experimental import pallas as pl
from jax.experimental.pallas import tpu as pltpu


def _round_up(n, m):
    return ((n + m - 1) // m) * m


# ----------------------------------------------------------------------------
# Parameter init (PyTorch nn.Linear-style uniform(-1/sqrt(fan_in), +)) and
# one-time packing into a single VMEM slab.
# ----------------------------------------------------------------------------
def init_params(key, hidden_dim, state_dim, output_dim):
    def linear(k, fan_in, fan_out):
        kw, kb = jax.random.split(k)
        bound = 1.0 / jnp.sqrt(jnp.float32(fan_in))
        w = jax.random.uniform(kw, (fan_in, fan_out), jnp.float32, -bound, bound)
        b = jax.random.uniform(kb, (1, fan_out), jnp.float32, -bound, bound)
        return w, b

    k1, k2, k3, k4 = jax.random.split(key, 4)
    w1, b1 = linear(k1, hidden_dim, state_dim)   # StateEncoder layer 1
    w2, b2 = linear(k2, state_dim, state_dim)    # StateEncoder layer 2
    ws, bs = linear(k3, state_dim, output_dim)   # self.sum
    wc, bc = linear(k4, state_dim, output_dim)   # self.carry
    return dict(w1=w1, b1=b1, w2=w2, b2=b2, ws=ws, bs=bs, wc=wc, bc=bc)


def pack_params(params, env_dim):
    """Pack all parameters into ONE [rows, C] f32 slab (single weight DMA).

    Layout (each segment's row offset is a multiple of 8 so static in-kernel
    slices never cross a sublane tile boundary):
        w1e [E,S] | w1a [A,S] | b1 [1,S] | w2 [S,S] | b2 [1,S] | wh [S,2O] | bh [1,2O]
    The two head Linears are fused into wh/bh ([S,2O]/[1,2O]) -> one MXU push.
    """
    w1, b1 = params["w1"], params["b1"]
    w2, b2 = params["w2"], params["b2"]
    wh = jnp.concatenate([params["ws"], params["wc"]], axis=1)   # [S, 2*O]
    bh = jnp.concatenate([params["bs"], params["bc"]], axis=1)   # [1, 2*O]
    H, S = w1.shape
    O2 = wh.shape[1]
    C = max(S, O2)

    segs = [("w1e", w1[:env_dim]), ("w1a", w1[env_dim:]), ("b1", b1),
            ("w2", w2), ("b2", b2), ("wh", wh), ("bh", bh)]
    offs, blocks, row = {}, [], 0
    for name, a in segs:
        r, c = a.shape
        rp = _round_up(r, 8)                       # sublane-aligned segment
        blk = jnp.zeros((rp, C), jnp.float32).at[:r, :c].set(a.astype(jnp.float32))
        blocks.append(blk)
        offs[name] = row
        row += rp
    slab = jnp.concatenate(blocks, axis=0)         # [rows, C]
    meta = dict(H=H, S=S, O=O2 // 2, offs=offs)
    return dict(slab=slab, meta=meta)


# ----------------------------------------------------------------------------
# Kernel
# ----------------------------------------------------------------------------
def _make_kernel(meta):
    S, O = meta["S"], meta["O"]
    off = meta["offs"]
    O2 = 2 * O

    def kernel(env_ref, args_ref, p_ref, out_ref):
        f32 = jnp.float32
        E = env_ref.shape[1]
        A = args_ref.shape[1]

        # Static, tile-aligned views into the packed parameter slab.
        w1e = p_ref[off["w1e"]:off["w1e"] + E, :S]
        w1a = p_ref[off["w1a"]:off["w1a"] + A, :S]
        b1 = p_ref[off["b1"]:off["b1"] + 1, :S]
        w2 = p_ref[off["w2"]:off["w2"] + S, :S]
        b2 = p_ref[off["b2"]:off["b2"] + 1, :S]
        wh = p_ref[off["wh"]:off["wh"] + S, :O2]
        bh = p_ref[off["bh"]:off["bh"] + 1, :O2]

        # StateEncoder (assumed 2-layer ReLU MLP).  torch.cat([env, args]) is
        # folded in by dotting against the pre-split halves of W1 (the two
        # dots are independent -> they pipeline on the MXU).
        h = (jnp.dot(env_ref[...], w1e, preferred_element_type=f32)
             + jnp.dot(args_ref[...], w1a, preferred_element_type=f32) + b1)
        h = jnp.maximum(h, 0.0)
        z = jnp.maximum(jnp.dot(h, w2, preferred_element_type=f32) + b2, 0.0)

        # Fused sum/carry heads: single [S, 2*O] matmul + fused bias.
        logits = jnp.dot(z, wh, preferred_element_type=f32) + bh     # [TB, 2*O]

        # Shared-vreg dual log_softmax: one exp + one log for both heads,
        # built with a lane mask, finishing with a single full-width store.
        lane = jax.lax.broadcasted_iota(jnp.int32, logits.shape, 1)
        is_sum = lane < O
        neg = jnp.float32(-jnp.inf)
        m0 = jnp.max(jnp.where(is_sum, logits, neg), axis=-1, keepdims=True)
        m1 = jnp.max(jnp.where(is_sum, neg, logits), axis=-1, keepdims=True)
        s = logits - jnp.where(is_sum, m0, m1)
        e = jnp.exp(s)                                               # 1 EUP exp
        sum0 = jnp.sum(jnp.where(is_sum, e, 0.0), axis=-1, keepdims=True)
        sum1 = jnp.sum(jnp.where(is_sum, 0.0, e), axis=-1, keepdims=True)
        lse = jnp.log(jnp.where(is_sum, sum0, sum1))                 # 1 EUP log
        out_ref[...] = (s - lse).astype(out_ref.dtype)               # 1 store

    return kernel


# ----------------------------------------------------------------------------
# Wrapper
# ----------------------------------------------------------------------------
def encode_trainer_forward(env, args, packed):
    """env: [E] or [B,E]; args: [A] or [B,A] (E+A == hidden_dim).

    Returns (log_sum, log_carry), each [1,O] for single-sample input (matching
    EncodeTrainer.forward) or [B,O] for batched input.
    """
    slab, meta = packed["slab"], packed["meta"]
    O = meta["O"]
    O2 = 2 * O

    single = env.ndim == 1
    env2 = env.reshape(1, -1) if single else env
    args2 = args.reshape(1, -1) if single else args
    B, E = env2.shape
    A = args2.shape[1]
    P, C = slab.shape

    # Batch tile: multiple of 8 sublanes; grid over batch tiles for large B.
    TB = min(128, _round_up(B, 8))
    B_pad = _round_up(B, TB)
    if B_pad != B:
        env2 = jnp.pad(env2, ((0, B_pad - B), (0, 0)))
        args2 = jnp.pad(args2, ((0, B_pad - B), (0, 0)))

    out = pl.pallas_call(
        _make_kernel(meta),
        out_shape=jax.ShapeDtypeStruct((B_pad, O2), jnp.float32),
        grid_spec=pltpu.PrefetchScalarGridSpec(
            num_scalar_prefetch=0,
            grid=(B_pad // TB,),
            in_specs=[
                pl.BlockSpec((TB, E), lambda i: (i, 0)),
                pl.BlockSpec((TB, A), lambda i: (i, 0)),
                pl.BlockSpec((P, C), lambda i: (0, 0)),   # weights: 1 DMA, resident
            ],
            out_specs=pl.BlockSpec((TB, O2), lambda i: (i, 0)),
        ),
        compiler_params=pltpu.CompilerParams(
            dimension_semantics=("parallel",)),           # v7x: 2 TCs share batch
    )(env2, args2, slab)

    out = out[:B]
    return out[:, :O], out[:, O:]


# ----------------------------------------------------------------------------
# Pure-JAX reference (same math as the PyTorch module)
# ----------------------------------------------------------------------------
def _reference(env, args, p):
    env2 = env.reshape(1, -1) if env.ndim == 1 else env
    args2 = args.reshape(1, -1) if args.ndim == 1 else args
    feature = jnp.concatenate([env2, args2], axis=-1)
    h = jnp.maximum(feature @ p["w1"] + p["b1"], 0.0)
    z = jnp.maximum(h @ p["w2"] + p["b2"], 0.0)
    ls = jax.nn.log_softmax(z @ p["ws"] + p["bs"], axis=-1)
    lc = jax.nn.log_softmax(z @ p["wc"] + p["bc"], axis=-1)
    return ls, lc


if __name__ == "__main__":
    # Small shapes: env(24) + args(8) -> hidden_dim=32, state_dim=32, output_dim=16
    hidden_dim, state_dim, output_dim = 32, 32, 16
    env_dim, arg_dim = 24, 8

    key = jax.random.PRNGKey(0)
    k_env, k_arg, k_par, k_benv, k_barg = jax.random.split(key, 5)
    params = init_params(k_par, hidden_dim, state_dim, output_dim)
    packed = pack_params(params, env_dim)            # one-time repack

    # --- single-sample forward (the module's native B=1 semantics) ---
    env = jax.random.normal(k_env, (env_dim,), jnp.float32)
    args = jax.random.normal(k_arg, (arg_dim,), jnp.float32)
    log_sum, log_carry = encode_trainer_forward(env, args, packed)
    jax.block_until_ready((log_sum, log_carry))
    ref_sum, ref_carry = _reference(env, args, params)
    assert log_sum.shape == (1, output_dim) and log_carry.shape == (1, output_dim)
    assert jnp.allclose(log_sum, ref_sum, atol=1e-5)
    assert jnp.allclose(log_carry, ref_carry, atol=1e-5)

    # --- batched forward (amortizes launch + weight DMA across samples) ---
    B = 13
    env_b = jax.random.normal(k_benv, (B, env_dim), jnp.float32)
    args_b = jax.random.normal(k_barg, (B, arg_dim), jnp.float32)
    bsum, bcarry = encode_trainer_forward(env_b, args_b, packed)
    jax.block_until_ready((bsum, bcarry))
    rbs, rbc = _reference(env_b, args_b, params)
    assert bsum.shape == (B, output_dim) and bcarry.shape == (B, output_dim)
    assert jnp.allclose(bsum, rbs, atol=1e-5)
    assert jnp.allclose(bcarry, rbc, atol=1e-5)

    print("KERNEL_OK")
</pallas_src>

<mosaic_0001>
module attributes {stable_mosaic.version = 11 : i64} {
  func.func @kernel(%arg0: i32, %arg1: memref<8x24xf32, #tpu.memory_space<vmem>>, %arg2: memref<8x8xf32, #tpu.memory_space<vmem>>, %arg3: memref<120x32xf32, #tpu.memory_space<vmem>>, %arg4: memref<8x32xf32, #tpu.memory_space<vmem>>) attributes {dimension_semantics = [#tpu.dimension_semantics<parallel>], iteration_bounds = array<i64: 1>, scalar_prefetch = 0 : i64, scratch_operands = 0 : i64, tpu.core_type = #tpu.core_type<tc>, window_params = [{transform_indices = @transform_0, window_bounds = array<i64: 8, 24>}, {transform_indices = @transform_1, window_bounds = array<i64: 8, 8>}, {pipeline_mode = #tpu.pipeline_mode<synchronous>, transform_indices = @transform_2, window_bounds = array<i64: 120, 32>}, {transform_indices = @transform_3, window_bounds = array<i64: 8, 32>}]} {
    %c0 = arith.constant 0 : index
    %c0_0 = arith.constant 0 : index
    %0 = vector.load %arg3[%c0, %c0_0] : memref<120x32xf32, #tpu.memory_space<vmem>>, vector<24x32xf32>
    %c24 = arith.constant 24 : index
    %c0_1 = arith.constant 0 : index
    %1 = vector.load %arg3[%c24, %c0_1] : memref<120x32xf32, #tpu.memory_space<vmem>>, vector<8x32xf32>
    %c32 = arith.constant 32 : index
    %c0_2 = arith.constant 0 : index
    %2 = vector.load %arg3[%c32, %c0_2] : memref<120x32xf32, #tpu.memory_space<vmem>>, vector<1x32xf32>
    %c40 = arith.constant 40 : index
    %c0_3 = arith.constant 0 : index
    %3 = vector.load %arg3[%c40, %c0_3] : memref<120x32xf32, #tpu.memory_space<vmem>>, vector<32x32xf32>
    %c72 = arith.constant 72 : index
    %c0_4 = arith.constant 0 : index
    %4 = vector.load %arg3[%c72, %c0_4] : memref<120x32xf32, #tpu.memory_space<vmem>>, vector<1x32xf32>
    %c80 = arith.constant 80 : index
    %c0_5 = arith.constant 0 : index
    %5 = vector.load %arg3[%c80, %c0_5] : memref<120x32xf32, #tpu.memory_space<vmem>>, vector<32x32xf32>
    %c112 = arith.constant 112 : index
    %c0_6 = arith.constant 0 : index
    %6 = vector.load %arg3[%c112, %c0_6] : memref<120x32xf32, #tpu.memory_space<vmem>>, vector<1x32xf32>
    %c0_7 = arith.constant 0 : index
    %c0_8 = arith.constant 0 : index
    %7 = vector.load %arg1[%c0_7, %c0_8] : memref<8x24xf32, #tpu.memory_space<vmem>>, vector<8x24xf32>
    %cst = arith.constant dense<0.000000e+00> : vector<8x32xf32>
    %8 = tpu.matmul %7, %0, %cst {dimension_numbers = #tpu.dot_dimension_numbers<[1], [0], [0], [1], [0, 0, 1, 1], [], []>} : vector<8x24xf32>, vector<24x32xf32>, vector<8x32xf32> -> vector<8x32xf32>
    %c0_9 = arith.constant 0 : index
    %c0_10 = arith.constant 0 : index
    %9 = vector.load %arg2[%c0_9, %c0_10] : memref<8x8xf32, #tpu.memory_space<vmem>>, vector<8x8xf32>
    %cst_11 = arith.constant dense<0.000000e+00> : vector<8x32xf32>
    %10 = tpu.matmul %9, %1, %cst_11 {dimension_numbers = #tpu.dot_dimension_numbers<[1], [0], [0], [1], [0, 0, 1, 1], [], []>} : vector<8x8xf32>, vector<8x32xf32>, vector<8x32xf32> -> vector<8x32xf32>
    %11 = arith.addf %8, %10 : vector<8x32xf32>
    %12 = vector.broadcast %2 : vector<1x32xf32> to vector<8x32xf32>
    %13 = arith.addf %11, %12 : vector<8x32xf32>
    %cst_12 = arith.constant 0.000000e+00 : f32
    %14 = vector.broadcast %cst_12 : f32 to vector<8x32xf32>
    %15 = arith.maximumf %13, %14 : vector<8x32xf32>
    %cst_13 = arith.constant dense<0.000000e+00> : vector<8x32xf32>
    %16 = tpu.matmul %15, %3, %cst_13 {dimension_numbers = #tpu.dot_dimension_numbers<[1], [0], [0], [1], [0, 0, 1, 1], [], []>} : vector<8x32xf32>, vector<32x32xf32>, vector<8x32xf32> -> vector<8x32xf32>
    %17 = vector.broadcast %4 : vector<1x32xf32> to vector<8x32xf32>
    %18 = arith.addf %16, %17 : vector<8x32xf32>
    %cst_14 = arith.constant 0.000000e+00 : f32
    %19 = vector.broadcast %cst_14 : f32 to vector<8x32xf32>
    %20 = arith.maximumf %18, %19 : vector<8x32xf32>
    %cst_15 = arith.constant dense<0.000000e+00> : vector<8x32xf32>
    %21 = tpu.matmul %20, %5, %cst_15 {dimension_numbers = #tpu.dot_dimension_numbers<[1], [0], [0], [1], [0, 0, 1, 1], [], []>} : vector<8x32xf32>, vector<32x32xf32>, vector<8x32xf32> -> vector<8x32xf32>
    %22 = vector.broadcast %6 : vector<1x32xf32> to vector<8x32xf32>
    %23 = arith.addf %21, %22 : vector<8x32xf32>
    %24 = tpu.iota {dimensions = array<i32: 1>} : vector<8x32xi32>
    %c16_i32 = arith.constant 16 : i32
    %25 = vector.broadcast %c16_i32 : i32 to vector<8x32xi32>
    %26 = arith.cmpi slt, %24, %25 : vector<8x32xi32>
    %cst_16 = arith.constant 0xFF800000 : f32
    %27 = vector.broadcast %cst_16 : f32 to vector<8x32xf32>
    %28 = arith.select %26, %23, %27 : vector<8x32xi1>, vector<8x32xf32>
    %cst_17 = arith.constant dense<0xFF800000> : vector<8xf32>
    %29 = vector.multi_reduction <maximumf>, %28, %cst_17 [1] : vector<8x32xf32> to vector<8xf32>
    %30 = vector.shape_cast %29 : vector<8xf32> to vector<8x1xf32>
    %cst_18 = arith.constant 0xFF800000 : f32
    %31 = vector.broadcast %cst_18 : f32 to vector<8x32xf32>
    %32 = arith.select %26, %31, %23 : vector<8x32xi1>, vector<8x32xf32>
    %cst_19 = arith.constant dense<0xFF800000> : vector<8xf32>
    %33 = vector.multi_reduction <maximumf>, %32, %cst_19 [1] : vector<8x32xf32> to vector<8xf32>
    %34 = vector.shape_cast %33 : vector<8xf32> to vector<8x1xf32>
    %35 = vector.shape_cast %30 : vector<8x1xf32> to vector<8x1xf32>
    %36 = vector.broadcast %35 : vector<8x1xf32> to vector<8x32xf32>
    %37 = vector.shape_cast %34 : vector<8x1xf32> to vector<8x1xf32>
    %38 = vector.broadcast %37 : vector<8x1xf32> to vector<8x32xf32>
    %39 = arith.select %26, %36, %38 : vector<8x32xi1>, vector<8x32xf32>
    %40 = arith.subf %23, %39 : vector<8x32xf32>
    %41 = math.exp %40 : vector<8x32xf32>
    %cst_20 = arith.constant 0.000000e+00 : f32
    %42 = vector.broadcast %cst_20 : f32 to vector<8x32xf32>
    %43 = arith.select %26, %41, %42 : vector<8x32xi1>, vector<8x32xf32>
    %cst_21 = arith.constant dense<0.000000e+00> : vector<8xf32>
    %44 = vector.multi_reduction <add>, %43, %cst_21 [1] : vector<8x32xf32> to vector<8xf32>
    %45 = vector.shape_cast %44 : vector<8xf32> to vector<8x1xf32>
    %cst_22 = arith.constant 0.000000e+00 : f32
    %46 = vector.broadcast %cst_22 : f32 to vector<8x32xf32>
    %47 = arith.select %26, %46, %41 : vector<8x32xi1>, vector<8x32xf32>
    %cst_23 = arith.constant dense<0.000000e+00> : vector<8xf32>
    %48 = vector.multi_reduction <add>, %47, %cst_23 [1] : vector<8x32xf32> to vector<8xf32>
    %49 = vector.shape_cast %48 : vector<8xf32> to vector<8x1xf32>
    %50 = vector.shape_cast %45 : vector<8x1xf32> to vector<8x1xf32>
    %51 = vector.broadcast %50 : vector<8x1xf32> to vector<8x32xf32>
    %52 = vector.shape_cast %49 : vector<8x1xf32> to vector<8x1xf32>
    %53 = vector.broadcast %52 : vector<8x1xf32> to vector<8x32xf32>
    %54 = arith.select %26, %51, %53 : vector<8x32xi1>, vector<8x32xf32>
    %55 = math.log %54 : vector<8x32xf32>
    %56 = arith.subf %40, %55 : vector<8x32xf32>
    %c0_24 = arith.constant 0 : index
    %c0_25 = arith.constant 0 : index
    %57 = vector.load %arg4[%c0_24, %c0_25] : memref<8x32xf32, #tpu.memory_space<vmem>>, vector<8x32xf32>
    tpu.vector_store %arg4[%c0_24, %c0_25], %56 {strides = array<i32>} : memref<8x32xf32, #tpu.memory_space<vmem>>, vector<8x32xf32>,
    return
  }
  func.func @transform_0(%arg0: i32) -> (i32, i32) {
    %c0_i32 = arith.constant 0 : i32
    %c0_i32_0 = arith.constant 0 : i32
    return %arg0, %c0_i32 : i32, i32
  }
  func.func @transform_1(%arg0: i32) -> (i32, i32) {
    %c0_i32 = arith.constant 0 : i32
    %c0_i32_0 = arith.constant 0 : i32
    return %arg0, %c0_i32 : i32, i32
  }
  func.func @transform_2(%arg0: i32) -> (i32, i32) {
    %c0_i32 = arith.constant 0 : i32
    %c0_i32_0 = arith.constant 0 : i32
    %c0_i32_1 = arith.constant 0 : i32
    return %c0_i32, %c0_i32_0 : i32, i32
  }
  func.func @transform_3(%arg0: i32) -> (i32, i32) {
    %c0_i32 = arith.constant 0 : i32
    %c0_i32_0 = arith.constant 0 : i32
    return %arg0, %c0_i32 : i32, i32
  }
}

</mosaic_0001>

<bundles_post_ra>
// kernel: tpu_custom_call.1
= control target key start
LH: loop header
LB: loop body
LE: loop exit
PB: predicated region body
PF: predicated region fallthrough
CT: control target
= control target key end

     0   :  { %vm32_vm0 = vcmask 64512   ;;  %vm56_vm1 = vcmask 195584   ;;  %s303_s0 = inlined_call_operand.vmem [shape: f32[8,24], index: 0, kind: input, shape index: {}]   ;;  %s304_s1 = inlined_call_operand.vmem [shape: f32[8,8], index: 1, kind: input, shape index: {}]   ;;  %s305_s2 = inlined_call_operand.vmem [shape: f32[120,32], index: 2, kind: input, shape index: {}]   ;;  %s306_s3 = inlined_call_operand.hbm [shape: f32[8,32], index: 3, kind: output, shape index: {}]  }
   0x1   :  { %v17_v0 = vld [vmem:[%s305_s2 + $0x10] sm:$0xff]  ;;  %v16_v1 = vld [vmem:[%s305_s2 + $0x8] sm:$0xff]  ;;  %v18_v2 = vld [vmem:[%s305_s2 + $0x18] sm:$0xff] }
   0x2   :  { %73 = vmatpush.msra.mxu1 %v17_v0  ;;  %51 = vmatpush.msra.mxu0 %v18_v2  ;;  %v15_v3 = vld [vmem:[%s305_s2] sm:$0xff] }
   0x3   :  { %v31_v4 = vld [vmem:[%s304_s1] sm:$0xff] }
   0x4   :  { %177 = vmatmul.msk.f32.vlgmr.msra.gmra.mxu0 %vm32_vm0, %v31_v4  ;;  %74 = vmatpush.msra.mxu1 %v16_v1  ;;  %v30_v5 = vld [vmem:[%s303_s0] sm:$0xff] }
   0x5   :  { %8 = vsyncpa [#allocation3], 0  ;;  %v23_v6 = vld [vmem:[%s305_s2 + $0x40] sm:$0xff]  ;;  %v22_v7 = vld [vmem:[%s305_s2 + $0x38] sm:$0xff]  ;;  %vm84_vm2 = vcmask 261120   ;;  %v133_v24 = vlaneseq  ;;  %s168_s20 = sshll.u32 %s306_s3, 4  ;;  %s169_s20 = int_to_ptr.hbm [resolvable:$true] %s168_s20 }
   0x6   :  { %75 = vmatpush.msra.mxu1 %v15_v3  ;;  %100 = vmatpush.msra.mxu2 %v23_v6  ;;  %v21_v8 = vld [vmem:[%s305_s2 + $0x30] sm:$0xff]  ;;  %v20_v9 = vld [vmem:[%s305_s2 + $0x28] sm:$0xff]  ;;  %v182_v12 = vld [vmem:[%s305_s2 + $0x20] ss:$0 sm:$0xff] }
   0x7   :  { %178 = vmatmul.msk.f32.vlgmr.msra.gmra.mxu1 %vm56_vm1, %v30_v5  ;;  %v28_v10 = vld [vmem:[%s305_s2 + $0x68] sm:$0xff]  ;;  %v27_v17 = vld [vmem:[%s305_s2 + $0x60] sm:$0xff]  ;;  %v26_v18 = vld [vmem:[%s305_s2 + $0x58] sm:$0xff]  ;;  %v134_v25 = vand.u32 127, %v133_v24 }
   0x8   :  { %101 = vmatpush.msra.mxu2 %v22_v7  ;;  %125 = vmatpush.msra.mxu3 %v28_v10  ;;  %v25_v19 = vld [vmem:[%s305_s2 + $0x50] sm:$0xff]  ;;  %v183_v20 = vld [vmem:[%s305_s2 + $0x48] ss:$0 sm:$0xff] }
   0x9   :  { %v184_v26 = vld [vmem:[%s305_s2 + $0x70] ss:$0 sm:$0xff]  ;;  %vm135_vm3 = vcmp.lt.s32.totalorder %v134_v25, 16  ;;  %s215_s2 = smov [#allocation2]  }
   0xa   :  { %102 = vmatpush.msra.mxu2 %v21_v8  ;;  %126 = vmatpush.msra.mxu3 %v27_v17  ;;  %s166_s17 = sshll.u32 %s215_s2, 4  ;;  %s167_s17 = int_to_ptr.vmem [resolvable:$true] %s166_s17 }
   0xc   :  { %103 = vmatpush.msra.mxu2 %v20_v9  ;;  %127 = vmatpush.msra.mxu3 %v26_v18 }
   0xe   :  { %128 = vmatpush.msra.mxu3 %v25_v19 }
  0x81   :  { %v53_v11 = vpop.f32.mrf.mxu0 }
  0x84   :  { %v77_v13 = vpop.f32.mrf.mxu1 }
  0x85   :  { %v78_v14 = vadd.f32 %v77_v13, %v53_v11 }
  0x87   :  { %v81_v15 = vadd.f32 %v182_v12, %v78_v14 }
  0x89   :  { %v82_v16 = vmax.f32 %v81_v15, 0.0 }
  0x8b   :  { %179 = vmatmul.msk.f32.vlgmr.msra.gmra.mxu2 %vm84_vm2, %v82_v16 }
 0x10e   :  { %v105_v21 = vpop.f32.mrf.mxu2 }
 0x10f   :  { %v106_v22 = vadd.f32 %v183_v20, %v105_v21 }
 0x111   :  { %v108_v23 = vmax.f32 %v106_v22, 0.0 }
 0x113   :  { %180 = vmatmul.msk.f32.vlgmr.msra.gmra.mxu3 %vm84_vm2, %v108_v23 }
 0x196   :  { %v130_v27 = vpop.f32.mrf.mxu3 }
 0x197   :  { %v131_v28 = vadd.f32 %v184_v26, %v130_v27 }
 0x199   :  { %v136_v29 = vsel %vm135_vm3, %v131_v28, -inf  ;;  %v140_v31 = vsel %vm135_vm3, -inf, %v131_v28 }
 0x19a   :  { %v137_v30 = vsel %vm84_vm2, %v136_v29, -inf  ;;  %v141_v32 = vsel %vm84_vm2, %v140_v31, -inf }
 0x19b   :  { %138 = vmax.xlane.f32.xlu0 %v137_v30 }
 0x1a3   :  { %142 = vmax.xlane.f32.xlu0 %v141_v32 }
 0x20e   :  { %v139_v33 = vpop.xlane.xlu0 %138 }
 0x216   :  { %v143_v34 = vpop.xlane.xlu0 %142 }
 0x217   :  { %v144_v35 = vsel %vm135_vm3, %v139_v33, %v143_v34 }
 0x218   :  { %v145_v36 = vsub.f32 %v131_v28, %v144_v35 }
 0x21a   :  { %v146_v37 = vmul.f32 1.442695, %v145_v36 }
 0x21c   :  { %185 = vpow2.f32 %v146_v37 }
 0x222   :  { %v186_v38 = vpop.eup %185 }
 0x223   :  { %v148_v39 = vsel %vm135_vm3, %v186_v38, 0.0  ;;  %v152_v41 = vsel %vm135_vm3, 0.0, %v186_v38 }
 0x224   :  { %v149_v40 = vsel %vm84_vm2, %v148_v39, 0.0  ;;  %v153_v42 = vsel %vm84_vm2, %v152_v41, 0.0 }
 0x225   :  { %150 = vadd.xlane.f32.xlu1 %v149_v40 }
 0x22d   :  { %154 = vadd.xlane.f32.xlu1 %v153_v42 }
 0x298   :  { %v151_v43 = vpop.xlane.xlu1 %150 }
 0x2a0   :  { %v155_v44 = vpop.xlane.xlu1 %154 }
 0x2a1   :  { %v156_v45 = vsel %vm135_vm3, %v151_v43, %v155_v44 }
 0x2a2   :  { %187 = vlog2.f32 %v156_v45 }
 0x2a8   :  { %v188_v46 = vpop.eup %187 }
 0x2a9   :  { %v158_v47 = vmul.f32 0.6931472, %v188_v46 }
 0x2ab   :  { %v159_v48 = vsub.f32 %v145_v36, %v158_v47 }
 0x2ad   :  { %160 = vst.msk [vmem:[#allocation2] sm:$0xff] %vm84_vm2, %v159_v48 }
 0x2ae   :  { %171 = dma.vmem_to_hbm [thread:$0]  %s167_s17, 128, %s169_s20, [#allocation3]  }
 0x2af   :  { %213 = dma.done.wait [#allocation3], 128  }
 0x2b0   :  { %214 = vsyncadd [#allocation3], 4294967168 }
 0x2b1   :  { %176 = vsyncpa [#allocation3], 1 }

</bundles_post_ra>
